<compile_context>
chip_gen: v7x
topology: tpu7x:2x2x1
jax: 0.10.0
libtpu: 0.0.40
codegen_flags: <defaults>
</compile_context>

<pallas_src>
import functools

import jax
import jax.numpy as jnp
from jax import lax
from jax.experimental import pallas as pl
from jax.experimental.pallas import tpu as pltpu


# ----------------------------------------------------------------------------
# Fused Pallas kernel (one folded batch tile per grid step)
# ----------------------------------------------------------------------------
def _fusion_kernel(low_ref, hi_ref, w1_ref, b1_ref, masks_ref,
                   wa_ref, ba1_ref, wa2_ref, ba2_ref, wp_ref, bp_ref,
                   o_ref, stack_ref, *, wh):
    cl4, n = low_ref.shape                      # 4*Cl, Bt*Hh*Wh
    cl = cl4 // 4
    mid_c = ba1_ref.shape[0] // 4

    m_l = masks_ref[0:1, :]                     # coarse col != 0
    m_r = masks_ref[1:2, :]                     # coarse col != Wh-1
    m_t = masks_ref[2:3, :]                     # coarse row != 0
    m_b = masks_ref[3:4, :]                     # coarse row != Hh-1

    def lane_shift(v, d):
        # s[:, p] = v[:, p + d], zero fill out of range (static d).
        if d == 0:
            return v
        if d > 0:
            return jnp.concatenate(
                [v[:, d:], jnp.zeros((v.shape[0], d), v.dtype)], axis=1)
        return jnp.concatenate(
            [jnp.zeros((v.shape[0], -d), v.dtype), v[:, :d]], axis=1)

    def shift_clamp(v, d, m):
        # replicate-pad shift (bilinear stencil): out-of-range positions keep v.
        s = lane_shift(v, d)
        return v + m * (s - v)

    low = low_ref[...]                          # [4*Cl, N] f32, phase-split coarse
    hi = hi_ref[...]                            # [Ch, N]   f32, coarse resolution

    # ---- higher_conv: 1x1 conv + folded BatchNorm + ReLU (bf16 MXU, f32 acc) ----
    hp = jnp.dot(w1_ref[...], hi.astype(jnp.bfloat16),
                 preferred_element_type=jnp.float32)
    hp = jnp.maximum(hp + b1_ref[...], 0.0)     # [Cl, N]

    # ---- 2x bilinear upsample (align_corners=False) as a 0.25/0.75 stencil ------
    # Result stays phase-split: P_ab[c, y*Wh+x] = hup[c, 2y+a, 2x+b].
    xl = shift_clamp(hp, -1, m_l)               # value at x-1 (clamped at x==0)
    xr = shift_clamp(hp, +1, m_r)               # value at x+1 (clamped at x==Wh-1)
    a0 = 0.25 * xl + 0.75 * hp                  # full-res column 2x
    a1 = 0.75 * hp + 0.25 * xr                  # full-res column 2x+1

    def up_rows(v):
        u = shift_clamp(v, -wh, m_t)            # value at y-1 (clamped)
        d = shift_clamp(v, +wh, m_b)            # value at y+1 (clamped)
        return 0.25 * u + 0.75 * v, 0.75 * v + 0.25 * d

    p00, p10 = up_rows(a0)
    p01, p11 = up_rows(a1)
    hup = jnp.concatenate([p00, p01, p10, p11], axis=0)   # [4*Cl, N]

    # ---- 3x3 conv on the coarse phase-split grid ---------------------------------
    # Stack the 9 shifted taps along sublanes into one bf16 scratch, then run a
    # single large-K matmul against the tap-stacked weight.
    def conv3x3(xc, w_ref_):
        cin = xc.shape[0]
        x_l = lane_shift(xc, -1) * m_l          # neighbour x-1 (zero at x==0)
        x_r = lane_shift(xc, +1) * m_r          # neighbour x+1 (zero at x==Wh-1)
        variants = (x_l, xc, x_r)               # indexed by sx+1
        for sy in (-1, 0, 1):
            for sx in (-1, 0, 1):
                t = (sy + 1) * 3 + (sx + 1)
                v = lane_shift(variants[sx + 1], sy * wh)
                if sy == -1:
                    v = v * m_t                 # neighbour y-1 invalid at y==0
                elif sy == 1:
                    v = v * m_b                 # neighbour y+1 invalid at y==Hh-1
                stack_ref[pl.ds(t * cin, cin), :] = v.astype(stack_ref.dtype)
        return jnp.dot(w_ref_[...], stack_ref[pl.ds(0, 9 * cin), :],
                       preferred_element_type=jnp.float32)

    # attention conv (+ReLU) over the *virtual* concat([lower, upsampled])
    att_in = jnp.concatenate([low, hup], axis=0)            # [8*Cl, N]
    mid = jnp.maximum(conv3x3(att_in, wa_ref) + ba1_ref[...], 0.0)  # [4*mid_c, N]

    # attention 1x1 conv -> sigmoid -> mix, handled per output phase (VPU + XLU)
    wa2 = wa2_ref[...]                                       # [mid_c, 1]
    ba2 = ba2_ref[...]                                       # [1, 1]
    fused_parts = []
    for p in range(4):
        mid_p = mid[p * mid_c:(p + 1) * mid_c, :]
        logit = jnp.sum(mid_p * wa2, axis=0, keepdims=True) + ba2
        att = jax.nn.sigmoid(logit)                          # [1, N]
        low_p = low[p * cl:(p + 1) * cl, :]
        hup_p = hup[p * cl:(p + 1) * cl, :]
        fused_parts.append(low_p + att * (hup_p - low_p))
    fused = jnp.concatenate(fused_parts, axis=0)             # [4*Cl, N]

    # post 3x3 conv
    out = conv3x3(fused, wp_ref) + bp_ref[...]
    o_ref[...] = out.astype(o_ref.dtype)


# ----------------------------------------------------------------------------
# Wrapper-side helpers (all cheap, linear-size constants)
# ----------------------------------------------------------------------------
def bilinear_matrix(n_in, n_out):
    """Dense [n_out, n_in] PyTorch bilinear-upsample matrix (align_corners=False).
    Only used by the pure-JAX reference."""
    i = jnp.arange(n_out, dtype=jnp.float32)
    src = (i + 0.5) * (n_in / n_out) - 0.5
    src = jnp.clip(src, 0.0, n_in - 1.0)
    lo = jnp.floor(src).astype(jnp.int32)
    hi = jnp.minimum(lo + 1, n_in - 1)
    w_hi = src - lo.astype(jnp.float32)
    w_lo = 1.0 - w_hi
    return (w_lo[:, None] * jax.nn.one_hot(lo, n_in, dtype=jnp.float32)
            + w_hi[:, None] * jax.nn.one_hot(hi, n_in, dtype=jnp.float32))


def _phase_conv_weight(w_taps):
    """Full-res 3x3 taps [9, Cout, Cin] -> coarse-grid taps [9, 4*Cout, 4*Cin].

    Coarse channel ordering is phase-major: index = (a*2+b)*C + c, where (a, b)
    is the (row, col) parity of the full-resolution pixel.  Coarse tap (sy, sx)
    block ((a,b) -> (a',b')) carries original tap (dy, dx) = (2sy+a'-a, 2sx+b'-b)
    when that tap exists, else zero.
    """
    _, cout, cin = w_taps.shape
    zeros = jnp.zeros((cout, cin), w_taps.dtype)
    taps = []
    for sy in (-1, 0, 1):
        for sx in (-1, 0, 1):
            rows = []
            for a in (0, 1):
                for b in (0, 1):
                    cols = []
                    for ap in (0, 1):
                        for bq in (0, 1):
                            dy = 2 * sy + ap - a
                            dx = 2 * sx + bq - b
                            if -1 <= dy <= 1 and -1 <= dx <= 1:
                                cols.append(w_taps[(dy + 1) * 3 + (dx + 1)])
                            else:
                                cols.append(zeros)
                    rows.append(jnp.concatenate(cols, axis=1))
            taps.append(jnp.concatenate(rows, axis=0))
    return jnp.stack(taps, axis=0)


def _stack_taps(wc):
    """[9, Cout, Cin] -> [Cout, 9*Cin], matching the in-kernel tap-major scratch."""
    t, cout, cin = wc.shape
    return jnp.transpose(wc, (1, 0, 2)).reshape(cout, t * cin)


def _phase_split(x):
    """[B, C, H, W] -> [B, 4*C, (H//2)*(W//2)], phase-major coarse channels."""
    b, c, h, w = x.shape
    hh, wh = h // 2, w // 2
    x = x.reshape(b, c, hh, 2, wh, 2)
    x = jnp.transpose(x, (0, 3, 5, 1, 2, 4))          # [B, a, b, C, Hh, Wh]
    return x.reshape(b, 4 * c, hh * wh)


def _phase_merge(xc, h, w):
    """[B, 4*C, Hh*Wh] -> [B, C, H, W] (inverse of _phase_split)."""
    b = xc.shape[0]
    c = xc.shape[1] // 4
    hh, wh = h // 2, w // 2
    x = xc.reshape(b, 2, 2, c, hh, wh)                # [B, a, b, C, Hh, Wh]
    x = jnp.transpose(x, (0, 3, 4, 1, 5, 2))          # [B, C, Hh, a, Wh, b]
    return x.reshape(b, c, h, w)


def _fold_batch(x, bt):
    """[B, C, N] -> [B//bt, C, bt*N] (batch sub-tile folded into lanes)."""
    b, c, n = x.shape
    x = x.reshape(b // bt, bt, c, n)
    return jnp.transpose(x, (0, 2, 1, 3)).reshape(b // bt, c, bt * n)


def _unfold_batch(x, bt):
    g, c, btn = x.shape
    n = btn // bt
    x = x.reshape(g, c, bt, n)
    return jnp.transpose(x, (0, 2, 1, 3)).reshape(g * bt, c, n)


@jax.jit
def cross_level_fusion(lower_feat, higher_feat, params):
    """lower_feat:[B,Cl,H,W], higher_feat:[B,Ch,H/2,W/2] (NCHW) -> [B,Cl,H,W]."""
    B, Cl, H, W = lower_feat.shape
    _, Ch, Hh, Wh = higher_feat.shape
    Nh = Hh * Wh
    mid_c = params["ba1"].shape[0]

    # fold a batch sub-tile into the lane axis (lane-dense stores / matmuls even
    # for tiny feature maps); largest divisor of B with bt*Nh <= ~2048 lanes.
    bt = 1
    for cand in range(min(B, max(1, 2048 // Nh)), 0, -1):
        if B % cand == 0:
            bt = cand
            break
    n = bt * Nh

    f32, bf16 = jnp.float32, jnp.bfloat16

    # ---- constant prep (tiny now that the kron operator is gone; in production
    # ---- this would be hoisted/cached outside the per-step call) ----------------
    scale = params["bn_gamma"] * lax.rsqrt(params["bn_var"] + 1e-5)
    w1f = (params["w1"] * scale[:, None]).astype(bf16)                 # [Cl, Ch]
    b1f = ((params["b1"] - params["bn_mean"]) * scale
           + params["bn_beta"]).reshape(Cl, 1).astype(f32)

    wa_c = jnp.concatenate([_phase_conv_weight(params["wa1_low"]),
                            _phase_conv_weight(params["wa1_high"])], axis=2)
    wa_stk = _stack_taps(wa_c).astype(bf16)                 # [4*mid_c, 9*8*Cl]
    wp_stk = _stack_taps(_phase_conv_weight(params["wp"])).astype(bf16)  # [4Cl, 9*4Cl]
    ba1t = jnp.tile(params["ba1"], 4).reshape(4 * mid_c, 1).astype(f32)
    bpt = jnp.tile(params["bp"], 4).reshape(4 * Cl, 1).astype(f32)
    wa2 = params["wa2"].reshape(mid_c, 1).astype(f32)
    ba2 = params["ba2"].reshape(1, 1).astype(f32)

    # per-lane coarse-grid boundary masks, tiled across the folded batch tile
    xi = jnp.arange(Nh, dtype=jnp.int32) % Wh
    yi = jnp.arange(Nh, dtype=jnp.int32) // Wh
    masks = jnp.stack([(xi != 0), (xi != Wh - 1), (yi != 0), (yi != Hh - 1)])
    masks = jnp.tile(masks.astype(f32), (1, bt))            # [4, n]

    # ---- input layout prep (HBM-side transposes, linear cost) -------------------
    low_c = _fold_batch(_phase_split(lower_feat), bt)        # [B/bt, 4*Cl, n]
    hi_c = _fold_batch(higher_feat.reshape(B, Ch, Nh), bt)   # [B/bt, Ch,   n]

    # ---- per-step VMEM working set (rough, with headroom) -----------------------
    feat_bytes = 4 * n * (4 * Cl + Ch + 4 * Cl)              # in/out blocks (f32)
    temp_bytes = 4 * n * (16 * Cl)                           # conv temporaries
    stack_bytes = 2 * (9 * 8 * Cl) * n                       # bf16 tap scratch
    vmem_limit = int(min(max(4 * (feat_bytes + temp_bytes + stack_bytes),
                             16 * 1024 * 1024), 64 * 1024 * 1024))

    kernel = functools.partial(_fusion_kernel, wh=Wh)
    out_c = pl.pallas_call(
        kernel,
        out_shape=jax.ShapeDtypeStruct((B // bt, 4 * Cl, n), jnp.float32),
        grid=(B // bt,),
        in_specs=[
            pl.BlockSpec((None, 4 * Cl, n), lambda g: (g, 0, 0)),     # lower (phase split)
            pl.BlockSpec((None, Ch, n), lambda g: (g, 0, 0)),         # higher (coarse flat)
            pl.BlockSpec((Cl, Ch), lambda g: (0, 0)),                 # folded 1x1 weight
            pl.BlockSpec((Cl, 1), lambda g: (0, 0)),                  # folded 1x1 bias
            pl.BlockSpec((4, n), lambda g: (0, 0)),                   # boundary masks
            pl.BlockSpec((4 * mid_c, 9 * 8 * Cl), lambda g: (0, 0)),  # att conv weight
            pl.BlockSpec((4 * mid_c, 1), lambda g: (0, 0)),           # att conv bias
            pl.BlockSpec((mid_c, 1), lambda g: (0, 0)),               # att 1x1 weight
            pl.BlockSpec((1, 1), lambda g: (0, 0)),                   # att 1x1 bias
            pl.BlockSpec((4 * Cl, 9 * 4 * Cl), lambda g: (0, 0)),     # post conv weight
            pl.BlockSpec((4 * Cl, 1), lambda g: (0, 0)),              # post conv bias
        ],
        out_specs=pl.BlockSpec((None, 4 * Cl, n), lambda g: (g, 0, 0)),
        scratch_shapes=[pltpu.VMEM((9 * 8 * Cl, n), jnp.bfloat16)],   # stacked taps
        compiler_params=pltpu.CompilerParams(
            dimension_semantics=("parallel",),
            vmem_limit_bytes=vmem_limit),
    )(low_c, hi_c, w1f, b1f, masks, wa_stk, ba1t, wa2, ba2, wp_stk, bpt)

    out = _unfold_batch(out_c, bt)                            # [B, 4*Cl, Nh]
    return _phase_merge(out, H, W)                            # [B, Cl, H, W]


# ----------------------------------------------------------------------------
# Pure-JAX reference (NCHW, eval-mode BatchNorm) for correctness checking
# ----------------------------------------------------------------------------
def reference_forward(lower_feat, higher_feat, params):
    B, Cl, H, W = lower_feat.shape
    _, Ch, Hh, Wh = higher_feat.shape
    mid_c = params["ba1"].shape[0]
    hp = jnp.einsum("oc,bcyx->boyx", params["w1"], higher_feat,
                    precision=lax.Precision.HIGHEST) + params["b1"][None, :, None, None]
    hp = ((hp - params["bn_mean"][None, :, None, None])
          * lax.rsqrt(params["bn_var"][None, :, None, None] + 1e-5)
          * params["bn_gamma"][None, :, None, None]
          + params["bn_beta"][None, :, None, None])
    hp = jnp.maximum(hp, 0.0)
    Mh = bilinear_matrix(Hh, H)
    Mw = bilinear_matrix(Wh, W)
    hup = jnp.einsum("Hy,bcyx,Wx->bcHW", Mh, hp, Mw, precision=lax.Precision.HIGHEST)
    att_in = jnp.concatenate([lower_feat, hup], axis=1)
    wa1 = jnp.concatenate([params["wa1_low"], params["wa1_high"]], axis=-1)
    w_att1 = jnp.transpose(wa1.reshape(3, 3, mid_c, 2 * Cl), (2, 3, 0, 1))
    mid = lax.conv_general_dilated(att_in, w_att1, (1, 1), "SAME",
                                   dimension_numbers=("NCHW", "OIHW", "NCHW"),
                                   precision=lax.Precision.HIGHEST)
    mid = jnp.maximum(mid + params["ba1"][None, :, None, None], 0.0)
    logit = jnp.einsum("m,bmyx->byx", params["wa2"], mid,
                       precision=lax.Precision.HIGHEST) + params["ba2"][0]
    att = jax.nn.sigmoid(logit)[:, None]
    fused = att * hup + (1.0 - att) * lower_feat
    w_post = jnp.transpose(params["wp"].reshape(3, 3, Cl, Cl), (2, 3, 0, 1))
    out = lax.conv_general_dilated(fused, w_post, (1, 1), "SAME",
                                   dimension_numbers=("NCHW", "OIHW", "NCHW"),
                                   precision=lax.Precision.HIGHEST)
    return out + params["bp"][None, :, None, None]


# ----------------------------------------------------------------------------
if __name__ == "__main__":
    B, H, W = 2, 16, 16
    lower_c, higher_c = 8, 16
    mid_c = lower_c // 4
    Hh, Wh = H // 2, W // 2

    key = jax.random.PRNGKey(0)
    ks = jax.random.split(key, 14)

    lower_feat = jax.random.normal(ks[0], (B, lower_c, H, W), jnp.float32)
    higher_feat = jax.random.normal(ks[1], (B, higher_c, Hh, Wh), jnp.float32)

    params = {
        # higher_conv: Conv2d(higher_c, lower_c, 1) weight stored [Cout, Cin]
        "w1": 0.1 * jax.random.normal(ks[2], (lower_c, higher_c), jnp.float32),
        "b1": 0.1 * jax.random.normal(ks[3], (lower_c,), jnp.float32),
        # BatchNorm2d(lower_c) eval-mode parameters
        "bn_gamma": 1.0 + 0.05 * jax.random.normal(ks[4], (lower_c,), jnp.float32),
        "bn_beta": 0.05 * jax.random.normal(ks[5], (lower_c,), jnp.float32),
        "bn_mean": 0.05 * jax.random.normal(ks[6], (lower_c,), jnp.float32),
        "bn_var": jnp.ones((lower_c,), jnp.float32),
        # att conv1: Conv2d(2*lower_c, mid_c, 3, padding=1) split by input block,
        # laid out [tap = ky*3+kx, Cout, Cin]
        "wa1_low": 0.1 * jax.random.normal(ks[7], (9, mid_c, lower_c), jnp.float32),
        "wa1_high": 0.1 * jax.random.normal(ks[8], (9, mid_c, lower_c), jnp.float32),
        "ba1": 0.1 * jax.random.normal(ks[9], (mid_c,), jnp.float32),
        # att conv2: Conv2d(mid_c, 1, 1)
        "wa2": 0.1 * jax.random.normal(ks[10], (mid_c,), jnp.float32),
        "ba2": 0.1 * jax.random.normal(ks[11], (1,), jnp.float32),
        # post_conv: Conv2d(lower_c, lower_c, 3, padding=1) weight [tap, Cout, Cin]
        "wp": 0.1 * jax.random.normal(ks[12], (9, lower_c, lower_c), jnp.float32),
        "bp": 0.05 * jax.random.normal(ks[13], (lower_c,), jnp.float32),
    }

    out = cross_level_fusion(lower_feat, higher_feat, params)
    jax.block_until_ready(out)
    assert out.shape == (B, lower_c, H, W) and out.dtype == jnp.float32

    ref = reference_forward(lower_feat, higher_feat, params)
    err = float(jnp.max(jnp.abs(out - ref)))
    # bf16 MXU operands (f32 accumulation) -> ~1e-2-level absolute deviation from
    # the float32 HIGHEST-precision reference is expected.
    assert err < 8e-2, f"max |kernel - reference| = {err}"
    print("KERNEL_OK")
</pallas_src>

<mosaic_0001>
module attributes {stable_mosaic.version = 11 : i64} {
  func.func @_fusion_kernel(%arg0: i32, %arg1: memref<1x32x128xf32, #tpu.memory_space<vmem>>, %arg2: memref<1x16x128xf32, #tpu.memory_space<vmem>>, %arg3: memref<8x16xbf16, #tpu.memory_space<vmem>>, %arg4: memref<8x1xf32, #tpu.memory_space<vmem>>, %arg5: memref<4x128xf32, #tpu.memory_space<vmem>>, %arg6: memref<8x576xbf16, #tpu.memory_space<vmem>>, %arg7: memref<8x1xf32, #tpu.memory_space<vmem>>, %arg8: memref<2x1xf32, #tpu.memory_space<vmem>>, %arg9: memref<1x1xf32, #tpu.memory_space<vmem>>, %arg10: memref<32x288xbf16, #tpu.memory_space<vmem>>, %arg11: memref<32x1xf32, #tpu.memory_space<vmem>>, %arg12: memref<1x32x128xf32, #tpu.memory_space<vmem>>, %arg13: memref<576x128xbf16, #tpu.memory_space<vmem>>) attributes {dimension_semantics = [#tpu.dimension_semantics<parallel>], iteration_bounds = array<i64: 1>, scalar_prefetch = 0 : i64, scratch_operands = 1 : i64, tpu.core_type = #tpu.core_type<tc>, window_params = [{transform_indices = @transform_0, window_bounds = array<i64: 1, 32, 128>}, {transform_indices = @transform_1, window_bounds = array<i64: 1, 16, 128>}, {pipeline_mode = #tpu.pipeline_mode<synchronous>, transform_indices = @transform_2, window_bounds = array<i64: 8, 16>}, {pipeline_mode = #tpu.pipeline_mode<synchronous>, transform_indices = @transform_3, window_bounds = array<i64: 8, 1>}, {pipeline_mode = #tpu.pipeline_mode<synchronous>, transform_indices = @transform_4, window_bounds = array<i64: 4, 128>}, {pipeline_mode = #tpu.pipeline_mode<synchronous>, transform_indices = @transform_5, window_bounds = array<i64: 8, 576>}, {pipeline_mode = #tpu.pipeline_mode<synchronous>, transform_indices = @transform_6, window_bounds = array<i64: 8, 1>}, {pipeline_mode = #tpu.pipeline_mode<synchronous>, transform_indices = @transform_7, window_bounds = array<i64: 2, 1>}, {pipeline_mode = #tpu.pipeline_mode<synchronous>, transform_indices = @transform_8, window_bounds = array<i64: 1, 1>}, {pipeline_mode = #tpu.pipeline_mode<synchronous>, transform_indices = @transform_9, window_bounds = array<i64: 32, 288>}, {pipeline_mode = #tpu.pipeline_mode<synchronous>, transform_indices = @transform_10, window_bounds = array<i64: 32, 1>}, {transform_indices = @transform_11, window_bounds = array<i64: 1, 32, 128>}]} {
    %c0 = arith.constant 0 : index
    %c0_0 = arith.constant 0 : index
    %0 = vector.load %arg5[%c0, %c0_0] : memref<4x128xf32, #tpu.memory_space<vmem>>, vector<1x128xf32>
    %c1 = arith.constant 1 : index
    %c0_1 = arith.constant 0 : index
    %1 = vector.load %arg5[%c1, %c0_1] : memref<4x128xf32, #tpu.memory_space<vmem>>, vector<1x128xf32>
    %c2 = arith.constant 2 : index
    %c0_2 = arith.constant 0 : index
    %2 = vector.load %arg5[%c2, %c0_2] : memref<4x128xf32, #tpu.memory_space<vmem>>, vector<1x128xf32>
    %c3 = arith.constant 3 : index
    %c0_3 = arith.constant 0 : index
    %3 = vector.load %arg5[%c3, %c0_3] : memref<4x128xf32, #tpu.memory_space<vmem>>, vector<1x128xf32>
    %c0_4 = arith.constant 0 : index
    %c0_5 = arith.constant 0 : index
    %c0_6 = arith.constant 0 : index
    %4 = vector.load %arg1[%c0_4, %c0_5, %c0_6] : memref<1x32x128xf32, #tpu.memory_space<vmem>>, vector<1x32x128xf32>
    %5 = vector.shape_cast %4 : vector<1x32x128xf32> to vector<32x128xf32>
    %c0_7 = arith.constant 0 : index
    %c0_8 = arith.constant 0 : index
    %c0_9 = arith.constant 0 : index
    %6 = vector.load %arg2[%c0_7, %c0_8, %c0_9] : memref<1x16x128xf32, #tpu.memory_space<vmem>>, vector<1x16x128xf32>
    %7 = vector.shape_cast %6 : vector<1x16x128xf32> to vector<16x128xf32>
    %c0_10 = arith.constant 0 : index
    %c0_11 = arith.constant 0 : index
    %8 = vector.load %arg3[%c0_10, %c0_11] : memref<8x16xbf16, #tpu.memory_space<vmem>>, vector<8x16xbf16>
    %9 = arith.truncf %7 : vector<16x128xf32> to vector<16x128xbf16>
    %cst = arith.constant dense<0.000000e+00> : vector<8x128xf32>
    %10 = tpu.matmul %8, %9, %cst {dimension_numbers = #tpu.dot_dimension_numbers<[1], [0], [0], [1], [0, 0, 1, 1], [], []>} : vector<8x16xbf16>, vector<16x128xbf16>, vector<8x128xf32> -> vector<8x128xf32>
    %c0_12 = arith.constant 0 : index
    %c0_13 = arith.constant 0 : index
    %11 = vector.load %arg4[%c0_12, %c0_13] : memref<8x1xf32, #tpu.memory_space<vmem>>, vector<8x1xf32>
    %12 = vector.broadcast %11 : vector<8x1xf32> to vector<8x128xf32>
    %13 = arith.addf %10, %12 : vector<8x128xf32>
    %cst_14 = arith.constant 0.000000e+00 : f32
    %14 = vector.broadcast %cst_14 : f32 to vector<8x128xf32>
    %15 = arith.maximumf %13, %14 : vector<8x128xf32>
    %cst_15 = arith.constant 0.000000e+00 : f32
    %16 = vector.broadcast %cst_15 : f32 to vector<8x1xf32>
    %17 = vector.extract_strided_slice %15 {offsets = [0, 0], sizes = [8, 127], strides = [1, 1]} : vector<8x128xf32> to vector<8x127xf32>
    %18 = tpu.concatenate %16, %17 in 1 : vector<8x1xf32>, vector<8x127xf32> -> vector<8x128xf32>
    %19 = arith.subf %18, %15 : vector<8x128xf32>
    %20 = vector.broadcast %0 : vector<1x128xf32> to vector<8x128xf32>
    %21 = arith.mulf %20, %19 : vector<8x128xf32>
    %22 = arith.addf %15, %21 : vector<8x128xf32>
    %23 = vector.extract_strided_slice %15 {offsets = [0, 1], sizes = [8, 127], strides = [1, 1]} : vector<8x128xf32> to vector<8x127xf32>
    %cst_16 = arith.constant 0.000000e+00 : f32
    %24 = vector.broadcast %cst_16 : f32 to vector<8x1xf32>
    %25 = tpu.concatenate %23, %24 in 1 : vector<8x127xf32>, vector<8x1xf32> -> vector<8x128xf32>
    %26 = arith.subf %25, %15 : vector<8x128xf32>
    %27 = vector.broadcast %1 : vector<1x128xf32> to vector<8x128xf32>
    %28 = arith.mulf %27, %26 : vector<8x128xf32>
    %29 = arith.addf %15, %28 : vector<8x128xf32>
    %cst_17 = arith.constant 2.500000e-01 : f32
    %30 = vector.broadcast %cst_17 : f32 to vector<8x128xf32>
    %31 = arith.mulf %30, %22 : vector<8x128xf32>
    %cst_18 = arith.constant 7.500000e-01 : f32
    %32 = vector.broadcast %cst_18 : f32 to vector<8x128xf32>
    %33 = arith.mulf %32, %15 : vector<8x128xf32>
    %34 = arith.addf %31, %33 : vector<8x128xf32>
    %cst_19 = arith.constant 7.500000e-01 : f32
    %35 = vector.broadcast %cst_19 : f32 to vector<8x128xf32>
    %36 = arith.mulf %35, %15 : vector<8x128xf32>
    %cst_20 = arith.constant 2.500000e-01 : f32
    %37 = vector.broadcast %cst_20 : f32 to vector<8x128xf32>
    %38 = arith.mulf %37, %29 : vector<8x128xf32>
    %39 = arith.addf %36, %38 : vector<8x128xf32>
    %cst_21 = arith.constant 0.000000e+00 : f32
    %40 = vector.broadcast %cst_21 : f32 to vector<8x8xf32>
    %41 = vector.extract_strided_slice %34 {offsets = [0, 0], sizes = [8, 120], strides = [1, 1]} : vector<8x128xf32> to vector<8x120xf32>
    %42 = tpu.concatenate %40, %41 in 1 : vector<8x8xf32>, vector<8x120xf32> -> vector<8x128xf32>
    %43 = arith.subf %42, %34 : vector<8x128xf32>
    %44 = vector.broadcast %2 : vector<1x128xf32> to vector<8x128xf32>
    %45 = arith.mulf %44, %43 : vector<8x128xf32>
    %46 = arith.addf %34, %45 : vector<8x128xf32>
    %47 = vector.extract_strided_slice %34 {offsets = [0, 8], sizes = [8, 120], strides = [1, 1]} : vector<8x128xf32> to vector<8x120xf32>
    %cst_22 = arith.constant 0.000000e+00 : f32
    %48 = vector.broadcast %cst_22 : f32 to vector<8x8xf32>
    %49 = tpu.concatenate %47, %48 in 1 : vector<8x120xf32>, vector<8x8xf32> -> vector<8x128xf32>
    %50 = arith.subf %49, %34 : vector<8x128xf32>
    %51 = vector.broadcast %3 : vector<1x128xf32> to vector<8x128xf32>
    %52 = arith.mulf %51, %50 : vector<8x128xf32>
    %53 = arith.addf %34, %52 : vector<8x128xf32>
    %cst_23 = arith.constant 2.500000e-01 : f32
    %54 = vector.broadcast %cst_23 : f32 to vector<8x128xf32>
    %55 = arith.mulf %54, %46 : vector<8x128xf32>
    %cst_24 = arith.constant 7.500000e-01 : f32
    %56 = vector.broadcast %cst_24 : f32 to vector<8x128xf32>
    %57 = arith.mulf %56, %34 : vector<8x128xf32>
    %58 = arith.addf %55, %57 : vector<8x128xf32>
    %cst_25 = arith.constant 7.500000e-01 : f32
    %59 = vector.broadcast %cst_25 : f32 to vector<8x128xf32>
    %60 = arith.mulf %59, %34 : vector<8x128xf32>
    %cst_26 = arith.constant 2.500000e-01 : f32
    %61 = vector.broadcast %cst_26 : f32 to vector<8x128xf32>
    %62 = arith.mulf %61, %53 : vector<8x128xf32>
    %63 = arith.addf %60, %62 : vector<8x128xf32>
    %cst_27 = arith.constant 0.000000e+00 : f32
    %64 = vector.broadcast %cst_27 : f32 to vector<8x8xf32>
    %65 = vector.extract_strided_slice %39 {offsets = [0, 0], sizes = [8, 120], strides = [1, 1]} : vector<8x128xf32> to vector<8x120xf32>
    %66 = tpu.concatenate %64, %65 in 1 : vector<8x8xf32>, vector<8x120xf32> -> vector<8x128xf32>
    %67 = arith.subf %66, %39 : vector<8x128xf32>
    %68 = vector.broadcast %2 : vector<1x128xf32> to vector<8x128xf32>
    %69 = arith.mulf %68, %67 : vector<8x128xf32>
    %70 = arith.addf %39, %69 : vector<8x128xf32>
    %71 = vector.extract_strided_slice %39 {offsets = [0, 8], sizes = [8, 120], strides = [1, 1]} : vector<8x128xf32> to vector<8x120xf32>
    %cst_28 = arith.constant 0.000000e+00 : f32
    %72 = vector.broadcast %cst_28 : f32 to vector<8x8xf32>
    %73 = tpu.concatenate %71, %72 in 1 : vector<8x120xf32>, vector<8x8xf32> -> vector<8x128xf32>
    %74 = arith.subf %73, %39 : vector<8x128xf32>
    %75 = vector.broadcast %3 : vector<1x128xf32> to vector<8x128xf32>
    %76 = arith.mulf %75, %74 : vector<8x128xf32>
    %77 = arith.addf %39, %76 : vector<8x128xf32>
    %cst_29 = arith.constant 2.500000e-01 : f32
    %78 = vector.broadcast %cst_29 : f32 to vector<8x128xf32>
    %79 = arith.mulf %78, %70 : vector<8x128xf32>
    %cst_30 = arith.constant 7.500000e-01 : f32
    %80 = vector.broadcast %cst_30 : f32 to vector<8x128xf32>
    %81 = arith.mulf %80, %39 : vector<8x128xf32>
    %82 = arith.addf %79, %81 : vector<8x128xf32>
    %cst_31 = arith.constant 7.500000e-01 : f32
    %83 = vector.broadcast %cst_31 : f32 to vector<8x128xf32>
    %84 = arith.mulf %83, %39 : vector<8x128xf32>
    %cst_32 = arith.constant 2.500000e-01 : f32
    %85 = vector.broadcast %cst_32 : f32 to vector<8x128xf32>
    %86 = arith.mulf %85, %77 : vector<8x128xf32>
    %87 = arith.addf %84, %86 : vector<8x128xf32>
    %88 = tpu.concatenate %58, %82, %63, %87 in 0 : vector<8x128xf32>, vector<8x128xf32>, vector<8x128xf32>, vector<8x128xf32> -> vector<32x128xf32>
    %89 = tpu.concatenate %5, %88 in 0 : vector<32x128xf32>, vector<32x128xf32> -> vector<64x128xf32>
    %cst_33 = arith.constant 0.000000e+00 : f32
    %90 = vector.broadcast %cst_33 : f32 to vector<64x1xf32>
    %91 = vector.extract_strided_slice %89 {offsets = [0, 0], sizes = [64, 127], strides = [1, 1]} : vector<64x128xf32> to vector<64x127xf32>
    %92 = tpu.concatenate %90, %91 in 1 : vector<64x1xf32>, vector<64x127xf32> -> vector<64x128xf32>
    %93 = vector.broadcast %0 : vector<1x128xf32> to vector<64x128xf32>
    %94 = arith.mulf %92, %93 : vector<64x128xf32>
    %95 = vector.extract_strided_slice %89 {offsets = [0, 1], sizes = [64, 127], strides = [1, 1]} : vector<64x128xf32> to vector<64x127xf32>
    %cst_34 = arith.constant 0.000000e+00 : f32
    %96 = vector.broadcast %cst_34 : f32 to vector<64x1xf32>
    %97 = tpu.concatenate %95, %96 in 1 : vector<64x127xf32>, vector<64x1xf32> -> vector<64x128xf32>
    %98 = vector.broadcast %1 : vector<1x128xf32> to vector<64x128xf32>
    %99 = arith.mulf %97, %98 : vector<64x128xf32>
    %cst_35 = arith.constant 0.000000e+00 : f32
    %100 = vector.broadcast %cst_35 : f32 to vector<64x8xf32>
    %101 = vector.extract_strided_slice %94 {offsets = [0, 0], sizes = [64, 120], strides = [1, 1]} : vector<64x128xf32> to vector<64x120xf32>
    %102 = tpu.concatenate %100, %101 in 1 : vector<64x8xf32>, vector<64x120xf32> -> vector<64x128xf32>
    %103 = vector.broadcast %2 : vector<1x128xf32> to vector<64x128xf32>
    %104 = arith.mulf %102, %103 : vector<64x128xf32>
    %105 = arith.truncf %104 : vector<64x128xf32> to vector<64x128xbf16>
    %c0_36 = arith.constant 0 : index
    %c0_37 = arith.constant 0 : index
    %106 = vector.load %arg13[%c0_36, %c0_37] : memref<576x128xbf16, #tpu.memory_space<vmem>>, vector<64x128xbf16>
    tpu.vector_store %arg13[%c0_36, %c0_37], %105 {strides = array<i32>} : memref<576x128xbf16, #tpu.memory_space<vmem>>, vector<64x128xbf16>,
    %cst_38 = arith.constant 0.000000e+00 : f32
    %107 = vector.broadcast %cst_38 : f32 to vector<64x8xf32>
    %108 = vector.extract_strided_slice %89 {offsets = [0, 0], sizes = [64, 120], strides = [1, 1]} : vector<64x128xf32> to vector<64x120xf32>
    %109 = tpu.concatenate %107, %108 in 1 : vector<64x8xf32>, vector<64x120xf32> -> vector<64x128xf32>
    %110 = vector.broadcast %2 : vector<1x128xf32> to vector<64x128xf32>
    %111 = arith.mulf %109, %110 : vector<64x128xf32>
    %112 = arith.truncf %111 : vector<64x128xf32> to vector<64x128xbf16>
    %c64 = arith.constant 64 : index
    %c0_39 = arith.constant 0 : index
    %113 = vector.load %arg13[%c64, %c0_39] : memref<576x128xbf16, #tpu.memory_space<vmem>>, vector<64x128xbf16>
    tpu.vector_store %arg13[%c64, %c0_39], %112 {strides = array<i32>} : memref<576x128xbf16, #tpu.memory_space<vmem>>, vector<64x128xbf16>,
    %cst_40 = arith.constant 0.000000e+00 : f32
    %114 = vector.broadcast %cst_40 : f32 to vector<64x8xf32>
    %115 = vector.extract_strided_slice %99 {offsets = [0, 0], sizes = [64, 120], strides = [1, 1]} : vector<64x128xf32> to vector<64x120xf32>
    %116 = tpu.concatenate %114, %115 in 1 : vector<64x8xf32>, vector<64x120xf32> -> vector<64x128xf32>
    %117 = vector.broadcast %2 : vector<1x128xf32> to vector<64x128xf32>
    %118 = arith.mulf %116, %117 : vector<64x128xf32>
    %119 = arith.truncf %118 : vector<64x128xf32> to vector<64x128xbf16>
    %c128 = arith.constant 128 : index
    %c0_41 = arith.constant 0 : index
    %120 = vector.load %arg13[%c128, %c0_41] : memref<576x128xbf16, #tpu.memory_space<vmem>>, vector<64x128xbf16>
    tpu.vector_store %arg13[%c128, %c0_41], %119 {strides = array<i32>} : memref<576x128xbf16, #tpu.memory_space<vmem>>, vector<64x128xbf16>,
    %121 = arith.truncf %94 : vector<64x128xf32> to vector<64x128xbf16>
    %c192 = arith.constant 192 : index
    %c0_42 = arith.constant 0 : index
    %122 = vector.load %arg13[%c192, %c0_42] : memref<576x128xbf16, #tpu.memory_space<vmem>>, vector<64x128xbf16>
    tpu.vector_store %arg13[%c192, %c0_42], %121 {strides = array<i32>} : memref<576x128xbf16, #tpu.memory_space<vmem>>, vector<64x128xbf16>,
    %123 = arith.truncf %89 : vector<64x128xf32> to vector<64x128xbf16>
    %c256 = arith.constant 256 : index
    %c0_43 = arith.constant 0 : index
    %124 = vector.load %arg13[%c256, %c0_43] : memref<576x128xbf16, #tpu.memory_space<vmem>>, vector<64x128xbf16>
    tpu.vector_store %arg13[%c256, %c0_43], %123 {strides = array<i32>} : memref<576x128xbf16, #tpu.memory_space<vmem>>, vector<64x128xbf16>,
    %125 = arith.truncf %99 : vector<64x128xf32> to vector<64x128xbf16>
    %c320 = arith.constant 320 : index
    %c0_44 = arith.constant 0 : index
    %126 = vector.load %arg13[%c320, %c0_44] : memref<576x128xbf16, #tpu.memory_space<vmem>>, vector<64x128xbf16>
    tpu.vector_store %arg13[%c320, %c0_44], %125 {strides = array<i32>} : memref<576x128xbf16, #tpu.memory_space<vmem>>, vector<64x128xbf16>,
    %127 = vector.extract_strided_slice %94 {offsets = [0, 8], sizes = [64, 120], strides = [1, 1]} : vector<64x128xf32> to vector<64x120xf32>
    %cst_45 = arith.constant 0.000000e+00 : f32
    %128 = vector.broadcast %cst_45 : f32 to vector<64x8xf32>
    %129 = tpu.concatenate %127, %128 in 1 : vector<64x120xf32>, vector<64x8xf32> -> vector<64x128xf32>
    %130 = vector.broadcast %3 : vector<1x128xf32> to vector<64x128xf32>
    %131 = arith.mulf %129, %130 : vector<64x128xf32>
    %132 = arith.truncf %131 : vector<64x128xf32> to vector<64x128xbf16>
    %c384 = arith.constant 384 : index
    %c0_46 = arith.constant 0 : index
    %133 = vector.load %arg13[%c384, %c0_46] : memref<576x128xbf16, #tpu.memory_space<vmem>>, vector<64x128xbf16>
    tpu.vector_store %arg13[%c384, %c0_46], %132 {strides = array<i32>} : memref<576x128xbf16, #tpu.memory_space<vmem>>, vector<64x128xbf16>,
    %134 = vector.extract_strided_slice %89 {offsets = [0, 8], sizes = [64, 120], strides = [1, 1]} : vector<64x128xf32> to vector<64x120xf32>
    %cst_47 = arith.constant 0.000000e+00 : f32
    %135 = vector.broadcast %cst_47 : f32 to vector<64x8xf32>
    %136 = tpu.concatenate %134, %135 in 1 : vector<64x120xf32>, vector<64x8xf32> -> vector<64x128xf32>
    %137 = vector.broadcast %3 : vector<1x128xf32> to vector<64x128xf32>
    %138 = arith.mulf %136, %137 : vector<64x128xf32>
    %139 = arith.truncf %138 : vector<64x128xf32> to vector<64x128xbf16>
    %c448 = arith.constant 448 : index
    %c0_48 = arith.constant 0 : index
    %140 = vector.load %arg13[%c448, %c0_48] : memref<576x128xbf16, #tpu.memory_space<vmem>>, vector<64x128xbf16>
    tpu.vector_store %arg13[%c448, %c0_48], %139 {strides = array<i32>} : memref<576x128xbf16, #tpu.memory_space<vmem>>, vector<64x128xbf16>,
    %141 = vector.extract_strided_slice %99 {offsets = [0, 8], sizes = [64, 120], strides = [1, 1]} : vector<64x128xf32> to vector<64x120xf32>
    %cst_49 = arith.constant 0.000000e+00 : f32
    %142 = vector.broadcast %cst_49 : f32 to vector<64x8xf32>
    %143 = tpu.concatenate %141, %142 in 1 : vector<64x120xf32>, vector<64x8xf32> -> vector<64x128xf32>
    %144 = vector.broadcast %3 : vector<1x128xf32> to vector<64x128xf32>
    %145 = arith.mulf %143, %144 : vector<64x128xf32>
    %146 = arith.truncf %145 : vector<64x128xf32> to vector<64x128xbf16>
    %c512 = arith.constant 512 : index
    %c0_50 = arith.constant 0 : index
    %147 = vector.load %arg13[%c512, %c0_50] : memref<576x128xbf16, #tpu.memory_space<vmem>>, vector<64x128xbf16>
    tpu.vector_store %arg13[%c512, %c0_50], %146 {strides = array<i32>} : memref<576x128xbf16, #tpu.memory_space<vmem>>, vector<64x128xbf16>,
    %c0_51 = arith.constant 0 : index
    %c0_52 = arith.constant 0 : index
    %148 = vector.load %arg6[%c0_51, %c0_52] : memref<8x576xbf16, #tpu.memory_space<vmem>>, vector<8x576xbf16>
    %c0_53 = arith.constant 0 : index
    %c0_54 = arith.constant 0 : index
    %149 = vector.load %arg13[%c0_53, %c0_54] : memref<576x128xbf16, #tpu.memory_space<vmem>>, vector<576x128xbf16>
    %cst_55 = arith.constant dense<0.000000e+00> : vector<8x128xf32>
    %150 = tpu.matmul %148, %149, %cst_55 {dimension_numbers = #tpu.dot_dimension_numbers<[1], [0], [0], [1], [0, 0, 1, 1], [], []>} : vector<8x576xbf16>, vector<576x128xbf16>, vector<8x128xf32> -> vector<8x128xf32>
    %c0_56 = arith.constant 0 : index
    %c0_57 = arith.constant 0 : index
    %151 = vector.load %arg7[%c0_56, %c0_57] : memref<8x1xf32, #tpu.memory_space<vmem>>, vector<8x1xf32>
    %152 = vector.broadcast %151 : vector<8x1xf32> to vector<8x128xf32>
    %153 = arith.addf %150, %152 : vector<8x128xf32>
    %cst_58 = arith.constant 0.000000e+00 : f32
    %154 = vector.broadcast %cst_58 : f32 to vector<8x128xf32>
    %155 = arith.maximumf %153, %154 : vector<8x128xf32>
    %c0_59 = arith.constant 0 : index
    %c0_60 = arith.constant 0 : index
    %156 = vector.load %arg8[%c0_59, %c0_60] : memref<2x1xf32, #tpu.memory_space<vmem>>, vector<2x1xf32>
    %c0_61 = arith.constant 0 : index
    %c0_62 = arith.constant 0 : index
    %157 = vector.load %arg9[%c0_61, %c0_62] : memref<1x1xf32, #tpu.memory_space<vmem>>, vector<1x1xf32>
    %158 = vector.extract_strided_slice %155 {offsets = [0, 0], sizes = [2, 128], strides = [1, 1]} : vector<8x128xf32> to vector<2x128xf32>
    %159 = vector.broadcast %156 : vector<2x1xf32> to vector<2x128xf32>
    %160 = arith.mulf %158, %159 : vector<2x128xf32>
    %cst_63 = arith.constant dense<0.000000e+00> : vector<128xf32>
    %161 = vector.multi_reduction <add>, %160, %cst_63 [0] : vector<2x128xf32> to vector<128xf32>
    %162 = vector.shape_cast %161 : vector<128xf32> to vector<1x128xf32>
    %163 = vector.broadcast %157 : vector<1x1xf32> to vector<1x128xf32>
    %164 = arith.addf %162, %163 : vector<1x128xf32>
    %165 = arith.negf %164 : vector<1x128xf32>
    %166 = math.exp %165 : vector<1x128xf32>
    %cst_64 = arith.constant 1.000000e+00 : f32
    %167 = vector.broadcast %cst_64 : f32 to vector<1x128xf32>
    %168 = arith.addf %167, %166 : vector<1x128xf32>
    %169 = arith.divf %167, %168 : vector<1x128xf32>
    %170 = vector.extract_strided_slice %5 {offsets = [0, 0], sizes = [8, 128], strides = [1, 1]} : vector<32x128xf32> to vector<8x128xf32>
    %171 = vector.extract_strided_slice %88 {offsets = [0, 0], sizes = [8, 128], strides = [1, 1]} : vector<32x128xf32> to vector<8x128xf32>
    %172 = arith.subf %171, %170 : vector<8x128xf32>
    %173 = vector.broadcast %169 : vector<1x128xf32> to vector<8x128xf32>
    %174 = arith.mulf %173, %172 : vector<8x128xf32>
    %175 = arith.addf %170, %174 : vector<8x128xf32>
    %176 = vector.extract_strided_slice %155 {offsets = [2, 0], sizes = [2, 128], strides = [1, 1]} : vector<8x128xf32> to vector<2x128xf32>
    %177 = vector.broadcast %156 : vector<2x1xf32> to vector<2x128xf32>
    %178 = arith.mulf %176, %177 : vector<2x128xf32>
    %cst_65 = arith.constant dense<0.000000e+00> : vector<128xf32>
    %179 = vector.multi_reduction <add>, %178, %cst_65 [0] : vector<2x128xf32> to vector<128xf32>
    %180 = vector.shape_cast %179 : vector<128xf32> to vector<1x128xf32>
    %181 = vector.broadcast %157 : vector<1x1xf32> to vector<1x128xf32>
    %182 = arith.addf %180, %181 : vector<1x128xf32>
    %183 = arith.negf %182 : vector<1x128xf32>
    %184 = math.exp %183 : vector<1x128xf32>
    %cst_66 = arith.constant 1.000000e+00 : f32
    %185 = vector.broadcast %cst_66 : f32 to vector<1x128xf32>
    %186 = arith.addf %185, %184 : vector<1x128xf32>
    %187 = arith.divf %185, %186 : vector<1x128xf32>
    %188 = vector.extract_strided_slice %5 {offsets = [8, 0], sizes = [8, 128], strides = [1, 1]} : vector<32x128xf32> to vector<8x128xf32>
    %189 = vector.extract_strided_slice %88 {offsets = [8, 0], sizes = [8, 128], strides = [1, 1]} : vector<32x128xf32> to vector<8x128xf32>
    %190 = arith.subf %189, %188 : vector<8x128xf32>
    %191 = vector.broadcast %187 : vector<1x128xf32> to vector<8x128xf32>
    %192 = arith.mulf %191, %190 : vector<8x128xf32>
    %193 = arith.addf %188, %192 : vector<8x128xf32>
    %194 = vector.extract_strided_slice %155 {offsets = [4, 0], sizes = [2, 128], strides = [1, 1]} : vector<8x128xf32> to vector<2x128xf32>
    %195 = vector.broadcast %156 : vector<2x1xf32> to vector<2x128xf32>
    %196 = arith.mulf %194, %195 : vector<2x128xf32>
    %cst_67 = arith.constant dense<0.000000e+00> : vector<128xf32>
    %197 = vector.multi_reduction <add>, %196, %cst_67 [0] : vector<2x128xf32> to vector<128xf32>
    %198 = vector.shape_cast %197 : vector<128xf32> to vector<1x128xf32>
    %199 = vector.broadcast %157 : vector<1x1xf32> to vector<1x128xf32>
    %200 = arith.addf %198, %199 : vector<1x128xf32>
    %201 = arith.negf %200 : vector<1x128xf32>
    %202 = math.exp %201 : vector<1x128xf32>
    %cst_68 = arith.constant 1.000000e+00 : f32
    %203 = vector.broadcast %cst_68 : f32 to vector<1x128xf32>
    %204 = arith.addf %203, %202 : vector<1x128xf32>
    %205 = arith.divf %203, %204 : vector<1x128xf32>
    %206 = vector.extract_strided_slice %5 {offsets = [16, 0], sizes = [8, 128], strides = [1, 1]} : vector<32x128xf32> to vector<8x128xf32>
    %207 = vector.extract_strided_slice %88 {offsets = [16, 0], sizes = [8, 128], strides = [1, 1]} : vector<32x128xf32> to vector<8x128xf32>
    %208 = arith.subf %207, %206 : vector<8x128xf32>
    %209 = vector.broadcast %205 : vector<1x128xf32> to vector<8x128xf32>
    %210 = arith.mulf %209, %208 : vector<8x128xf32>
    %211 = arith.addf %206, %210 : vector<8x128xf32>
    %212 = vector.extract_strided_slice %155 {offsets = [6, 0], sizes = [2, 128], strides = [1, 1]} : vector<8x128xf32> to vector<2x128xf32>
    %213 = vector.broadcast %156 : vector<2x1xf32> to vector<2x128xf32>
    %214 = arith.mulf %212, %213 : vector<2x128xf32>
    %cst_69 = arith.constant dense<0.000000e+00> : vector<128xf32>
    %215 = vector.multi_reduction <add>, %214, %cst_69 [0] : vector<2x128xf32> to vector<128xf32>
    %216 = vector.shape_cast %215 : vector<128xf32> to vector<1x128xf32>
    %217 = vector.broadcast %157 : vector<1x1xf32> to vector<1x128xf32>
    %218 = arith.addf %216, %217 : vector<1x128xf32>
    %219 = arith.negf %218 : vector<1x128xf32>
    %220 = math.exp %219 : vector<1x128xf32>
    %cst_70 = arith.constant 1.000000e+00 : f32
    %221 = vector.broadcast %cst_70 : f32 to vector<1x128xf32>
    %222 = arith.addf %221, %220 : vector<1x128xf32>
    %223 = arith.divf %221, %222 : vector<1x128xf32>
    %224 = vector.extract_strided_slice %5 {offsets = [24, 0], sizes = [8, 128], strides = [1, 1]} : vector<32x128xf32> to vector<8x128xf32>
    %225 = vector.extract_strided_slice %88 {offsets = [24, 0], sizes = [8, 128], strides = [1, 1]} : vector<32x128xf32> to vector<8x128xf32>
    %226 = arith.subf %225, %224 : vector<8x128xf32>
    %227 = vector.broadcast %223 : vector<1x128xf32> to vector<8x128xf32>
    %228 = arith.mulf %227, %226 : vector<8x128xf32>
    %229 = arith.addf %224, %228 : vector<8x128xf32>
    %230 = tpu.concatenate %175, %193, %211, %229 in 0 : vector<8x128xf32>, vector<8x128xf32>, vector<8x128xf32>, vector<8x128xf32> -> vector<32x128xf32>
    %cst_71 = arith.constant 0.000000e+00 : f32
    %231 = vector.broadcast %cst_71 : f32 to vector<32x1xf32>
    %232 = vector.extract_strided_slice %230 {offsets = [0, 0], sizes = [32, 127], strides = [1, 1]} : vector<32x128xf32> to vector<32x127xf32>
    %233 = tpu.concatenate %231, %232 in 1 : vector<32x1xf32>, vector<32x127xf32> -> vector<32x128xf32>
    %234 = vector.broadcast %0 : vector<1x128xf32> to vector<32x128xf32>
    %235 = arith.mulf %233, %234 : vector<32x128xf32>
    %236 = vector.extract_strided_slice %230 {offsets = [0, 1], sizes = [32, 127], strides = [1, 1]} : vector<32x128xf32> to vector<32x127xf32>
    %cst_72 = arith.constant 0.000000e+00 : f32
    %237 = vector.broadcast %cst_72 : f32 to vector<32x1xf32>
    %238 = tpu.concatenate %236, %237 in 1 : vector<32x127xf32>, vector<32x1xf32> -> vector<32x128xf32>
    %239 = vector.broadcast %1 : vector<1x128xf32> to vector<32x128xf32>
    %240 = arith.mulf %238, %239 : vector<32x128xf32>
    %cst_73 = arith.constant 0.000000e+00 : f32
    %241 = vector.broadcast %cst_73 : f32 to vector<32x8xf32>
    %242 = vector.extract_strided_slice %235 {offsets = [0, 0], sizes = [32, 120], strides = [1, 1]} : vector<32x128xf32> to vector<32x120xf32>
    %243 = tpu.concatenate %241, %242 in 1 : vector<32x8xf32>, vector<32x120xf32> -> vector<32x128xf32>
    %244 = vector.broadcast %2 : vector<1x128xf32> to vector<32x128xf32>
    %245 = arith.mulf %243, %244 : vector<32x128xf32>
    %246 = arith.truncf %245 : vector<32x128xf32> to vector<32x128xbf16>
    %c0_74 = arith.constant 0 : index
    %c0_75 = arith.constant 0 : index
    %247 = vector.load %arg13[%c0_74, %c0_75] : memref<576x128xbf16, #tpu.memory_space<vmem>>, vector<32x128xbf16>
    tpu.vector_store %arg13[%c0_74, %c0_75], %246 {strides = array<i32>} : memref<576x128xbf16, #tpu.memory_space<vmem>>, vector<32x128xbf16>,
    %cst_76 = arith.constant 0.000000e+00 : f32
    %248 = vector.broadcast %cst_76 : f32 to vector<32x8xf32>
    %249 = vector.extract_strided_slice %230 {offsets = [0, 0], sizes = [32, 120], strides = [1, 1]} : vector<32x128xf32> to vector<32x120xf32>
    %250 = tpu.concatenate %248, %249 in 1 : vector<32x8xf32>, vector<32x120xf32> -> vector<32x128xf32>
    %251 = vector.broadcast %2 : vector<1x128xf32> to vector<32x128xf32>
    %252 = arith.mulf %250, %251 : vector<32x128xf32>
    %253 = arith.truncf %252 : vector<32x128xf32> to vector<32x128xbf16>
    %c32 = arith.constant 32 : index
    %c0_77 = arith.constant 0 : index
    %254 = vector.load %arg13[%c32, %c0_77] : memref<576x128xbf16, #tpu.memory_space<vmem>>, vector<32x128xbf16>
    tpu.vector_store %arg13[%c32, %c0_77], %253 {strides = array<i32>} : memref<576x128xbf16, #tpu.memory_space<vmem>>, vector<32x128xbf16>,
    %cst_78 = arith.constant 0.000000e+00 : f32
    %255 = vector.broadcast %cst_78 : f32 to vector<32x8xf32>
    %256 = vector.extract_strided_slice %240 {offsets = [0, 0], sizes = [32, 120], strides = [1, 1]} : vector<32x128xf32> to vector<32x120xf32>
    %257 = tpu.concatenate %255, %256 in 1 : vector<32x8xf32>, vector<32x120xf32> -> vector<32x128xf32>
    %258 = vector.broadcast %2 : vector<1x128xf32> to vector<32x128xf32>
    %259 = arith.mulf %257, %258 : vector<32x128xf32>
    %260 = arith.truncf %259 : vector<32x128xf32> to vector<32x128xbf16>
    %c64_79 = arith.constant 64 : index
    %c0_80 = arith.constant 0 : index
    %261 = vector.load %arg13[%c64_79, %c0_80] : memref<576x128xbf16, #tpu.memory_space<vmem>>, vector<32x128xbf16>
    tpu.vector_store %arg13[%c64_79, %c0_80], %260 {strides = array<i32>} : memref<576x128xbf16, #tpu.memory_space<vmem>>, vector<32x128xbf16>,
    %262 = arith.truncf %235 : vector<32x128xf32> to vector<32x128xbf16>
    %c96 = arith.constant 96 : index
    %c0_81 = arith.constant 0 : index
    %263 = vector.load %arg13[%c96, %c0_81] : memref<576x128xbf16, #tpu.memory_space<vmem>>, vector<32x128xbf16>
    tpu.vector_store %arg13[%c96, %c0_81], %262 {strides = array<i32>} : memref<576x128xbf16, #tpu.memory_space<vmem>>, vector<32x128xbf16>,
    %264 = arith.truncf %230 : vector<32x128xf32> to vector<32x128xbf16>
    %c128_82 = arith.constant 128 : index
    %c0_83 = arith.constant 0 : index
    %265 = vector.load %arg13[%c128_82, %c0_83] : memref<576x128xbf16, #tpu.memory_space<vmem>>, vector<32x128xbf16>
    tpu.vector_store %arg13[%c128_82, %c0_83], %264 {strides = array<i32>} : memref<576x128xbf16, #tpu.memory_space<vmem>>, vector<32x128xbf16>,
    %266 = arith.truncf %240 : vector<32x128xf32> to vector<32x128xbf16>
    %c160 = arith.constant 160 : index
    %c0_84 = arith.constant 0 : index
    %267 = vector.load %arg13[%c160, %c0_84] : memref<576x128xbf16, #tpu.memory_space<vmem>>, vector<32x128xbf16>
    tpu.vector_store %arg13[%c160, %c0_84], %266 {strides = array<i32>} : memref<576x128xbf16, #tpu.memory_space<vmem>>, vector<32x128xbf16>,
    %268 = vector.extract_strided_slice %235 {offsets = [0, 8], sizes = [32, 120], strides = [1, 1]} : vector<32x128xf32> to vector<32x120xf32>
    %cst_85 = arith.constant 0.000000e+00 : f32
    %269 = vector.broadcast %cst_85 : f32 to vector<32x8xf32>
    %270 = tpu.concatenate %268, %269 in 1 : vector<32x120xf32>, vector<32x8xf32> -> vector<32x128xf32>
    %271 = vector.broadcast %3 : vector<1x128xf32> to vector<32x128xf32>
    %272 = arith.mulf %270, %271 : vector<32x128xf32>
    %273 = arith.truncf %272 : vector<32x128xf32> to vector<32x128xbf16>
    %c192_86 = arith.constant 192 : index
    %c0_87 = arith.constant 0 : index
    %274 = vector.load %arg13[%c192_86, %c0_87] : memref<576x128xbf16, #tpu.memory_space<vmem>>, vector<32x128xbf16>
    tpu.vector_store %arg13[%c192_86, %c0_87], %273 {strides = array<i32>} : memref<576x128xbf16, #tpu.memory_space<vmem>>, vector<32x128xbf16>,
    %275 = vector.extract_strided_slice %230 {offsets = [0, 8], sizes = [32, 120], strides = [1, 1]} : vector<32x128xf32> to vector<32x120xf32>
    %cst_88 = arith.constant 0.000000e+00 : f32
    %276 = vector.broadcast %cst_88 : f32 to vector<32x8xf32>
    %277 = tpu.concatenate %275, %276 in 1 : vector<32x120xf32>, vector<32x8xf32> -> vector<32x128xf32>
    %278 = vector.broadcast %3 : vector<1x128xf32> to vector<32x128xf32>
    %279 = arith.mulf %277, %278 : vector<32x128xf32>
    %280 = arith.truncf %279 : vector<32x128xf32> to vector<32x128xbf16>
    %c224 = arith.constant 224 : index
    %c0_89 = arith.constant 0 : index
    %281 = vector.load %arg13[%c224, %c0_89] : memref<576x128xbf16, #tpu.memory_space<vmem>>, vector<32x128xbf16>
    tpu.vector_store %arg13[%c224, %c0_89], %280 {strides = array<i32>} : memref<576x128xbf16, #tpu.memory_space<vmem>>, vector<32x128xbf16>,
    %282 = vector.extract_strided_slice %240 {offsets = [0, 8], sizes = [32, 120], strides = [1, 1]} : vector<32x128xf32> to vector<32x120xf32>
    %cst_90 = arith.constant 0.000000e+00 : f32
    %283 = vector.broadcast %cst_90 : f32 to vector<32x8xf32>
    %284 = tpu.concatenate %282, %283 in 1 : vector<32x120xf32>, vector<32x8xf32> -> vector<32x128xf32>
    %285 = vector.broadcast %3 : vector<1x128xf32> to vector<32x128xf32>
    %286 = arith.mulf %284, %285 : vector<32x128xf32>
    %287 = arith.truncf %286 : vector<32x128xf32> to vector<32x128xbf16>
    %c256_91 = arith.constant 256 : index
    %c0_92 = arith.constant 0 : index
    %288 = vector.load %arg13[%c256_91, %c0_92] : memref<576x128xbf16, #tpu.memory_space<vmem>>, vector<32x128xbf16>
    tpu.vector_store %arg13[%c256_91, %c0_92], %287 {strides = array<i32>} : memref<576x128xbf16, #tpu.memory_space<vmem>>, vector<32x128xbf16>,
    %c0_93 = arith.constant 0 : index
    %c0_94 = arith.constant 0 : index
    %289 = vector.load %arg10[%c0_93, %c0_94] : memref<32x288xbf16, #tpu.memory_space<vmem>>, vector<32x288xbf16>
    %c0_95 = arith.constant 0 : index
    %c0_96 = arith.constant 0 : index
    %290 = vector.load %arg13[%c0_95, %c0_96] : memref<576x128xbf16, #tpu.memory_space<vmem>>, vector<288x128xbf16>
    %cst_97 = arith.constant dense<0.000000e+00> : vector<32x128xf32>
    %291 = tpu.matmul %289, %290, %cst_97 {dimension_numbers = #tpu.dot_dimension_numbers<[1], [0], [0], [1], [0, 0, 1, 1], [], []>} : vector<32x288xbf16>, vector<288x128xbf16>, vector<32x128xf32> -> vector<32x128xf32>
    %c0_98 = arith.constant 0 : index
    %c0_99 = arith.constant 0 : index
    %292 = vector.load %arg11[%c0_98, %c0_99] : memref<32x1xf32, #tpu.memory_space<vmem>>, vector<32x1xf32>
    %293 = vector.broadcast %292 : vector<32x1xf32> to vector<32x128xf32>
    %294 = arith.addf %291, %293 : vector<32x128xf32>
    %c0_100 = arith.constant 0 : index
    %c0_101 = arith.constant 0 : index
    %c0_102 = arith.constant 0 : index
    %295 = vector.load %arg12[%c0_100, %c0_101, %c0_102] : memref<1x32x128xf32, #tpu.memory_space<vmem>>, vector<1x32x128xf32>
    %296 = vector.shape_cast %295 : vector<1x32x128xf32> to vector<32x128xf32>
    %297 = vector.shape_cast %294 : vector<32x128xf32> to vector<1x32x128xf32>
    tpu.vector_store %arg12[%c0_100, %c0_101, %c0_102], %297 {strides = array<i32>} : memref<1x32x128xf32, #tpu.memory_space<vmem>>, vector<1x32x128xf32>,
    return
  }
  func.func @transform_0(%arg0: i32) -> (i32, i32, i32) {
    %c0_i32 = arith.constant 0 : i32
    %c0_i32_0 = arith.constant 0 : i32
    %c0_i32_1 = arith.constant 0 : i32
    return %arg0, %c0_i32, %c0_i32_0 : i32, i32, i32
  }
  func.func @transform_1(%arg0: i32) -> (i32, i32, i32) {
    %c0_i32 = arith.constant 0 : i32
    %c0_i32_0 = arith.constant 0 : i32
    %c0_i32_1 = arith.constant 0 : i32
    return %arg0, %c0_i32, %c0_i32_0 : i32, i32, i32
  }
  func.func @transform_2(%arg0: i32) -> (i32, i32) {
    %c0_i32 = arith.constant 0 : i32
    %c0_i32_0 = arith.constant 0 : i32
    %c0_i32_1 = arith.constant 0 : i32
    return %c0_i32, %c0_i32_0 : i32, i32
  }
  func.func @transform_3(%arg0: i32) -> (i32, i32) {
    %c0_i32 = arith.constant 0 : i32
    %c0_i32_0 = arith.constant 0 : i32
    %c0_i32_1 = arith.constant 0 : i32
    return %c0_i32, %c0_i32_0 : i32, i32
  }
  func.func @transform_4(%arg0: i32) -> (i32, i32) {
    %c0_i32 = arith.constant 0 : i32
    %c0_i32_0 = arith.constant 0 : i32
    %c0_i32_1 = arith.constant 0 : i32
    return %c0_i32, %c0_i32_0 : i32, i32
  }
  func.func @transform_5(%arg0: i32) -> (i32, i32) {
    %c0_i32 = arith.constant 0 : i32
    %c0_i32_0 = arith.constant 0 : i32
    %c0_i32_1 = arith.constant 0 : i32
    return %c0_i32, %c0_i32_0 : i32, i32
  }
  func.func @transform_6(%arg0: i32) -> (i32, i32) {
    %c0_i32 = arith.constant 0 : i32
    %c0_i32_0 = arith.constant 0 : i32
    %c0_i32_1 = arith.constant 0 : i32
    return %c0_i32, %c0_i32_0 : i32, i32
  }
  func.func @transform_7(%arg0: i32) -> (i32, i32) {
    %c0_i32 = arith.constant 0 : i32
    %c0_i32_0 = arith.constant 0 : i32
    %c0_i32_1 = arith.constant 0 : i32
    return %c0_i32, %c0_i32_0 : i32, i32
  }
  func.func @transform_8(%arg0: i32) -> (i32, i32) {
    %c0_i32 = arith.constant 0 : i32
    %c0_i32_0 = arith.constant 0 : i32
    %c0_i32_1 = arith.constant 0 : i32
    return %c0_i32, %c0_i32_0 : i32, i32
  }
  func.func @transform_9(%arg0: i32) -> (i32, i32) {
    %c0_i32 = arith.constant 0 : i32
    %c0_i32_0 = arith.constant 0 : i32
    %c0_i32_1 = arith.constant 0 : i32
    return %c0_i32, %c0_i32_0 : i32, i32
  }
  func.func @transform_10(%arg0: i32) -> (i32, i32) {
    %c0_i32 = arith.constant 0 : i32
    %c0_i32_0 = arith.constant 0 : i32
    %c0_i32_1 = arith.constant 0 : i32
    return %c0_i32, %c0_i32_0 : i32, i32
  }
  func.func @transform_11(%arg0: i32) -> (i32, i32, i32) {
    %c0_i32 = arith.constant 0 : i32
    %c0_i32_0 = arith.constant 0 : i32
    %c0_i32_1 = arith.constant 0 : i32
    return %arg0, %c0_i32, %c0_i32_0 : i32, i32, i32
  }
}

</mosaic_0001>

<bundles_post_ra>
// kernel: tile.29
= control target key start
LH: loop header
LB: loop body
LE: loop exit
PB: predicated region body
PF: predicated region fallthrough
CT: control target
= control target key end

     0   :  { %vm21_vm0 = vcmask 523264   ;;  %vm27_vm1 = vcmask 1048064   ;;  %s67_s0 = inlined_call_operand.vmem [shape: f32[4,2,64], index: 0, kind: input, shape index: {}]   ;;  %s68_s1 = inlined_call_operand.vmem [shape: f32[4,128], index: 1, kind: output, shape index: {}]  }
   0x1   :  { %v37_v0 = vld [vmem:[%s67_s0 + $0x6] sm:$0x3]  ;;  %v38_v1 = vld [vmem:[%s67_s0 + $0x4] sm:$0x3]  ;;  %v39_v2 = vld [vmem:[%s67_s0 + $0x2] sm:$0x3] }
   0x2   :  { %8 = vst [vmem:[#allocation1 + $0x18] sm:$0x3] %v37_v0  ;;  %13 = vst [vmem:[#allocation1 + $0x10] sm:$0x3] %v38_v1  ;;  %v18_v3 = vld [vmem:[%s67_s0] sm:$0x3] }
   0x3   :  { %17 = vst [vmem:[#allocation1 + $0x8] sm:$0x3] %v39_v2  ;;  %19 = vst [vmem:[#allocation1] sm:$0x3] %v18_v3  ;;  %s41_s0 = smov 64  }
   0xa   :  { %v24_v4 = vld [vmem:[#allocation1 + $0x1] ss:$8 sm:$0xf]   ;;  %v20_v5 = vld [vmem:[#allocation1] ss:$8 sm:$0xf]  }
   0xb   :  { %25 = vrot.lane.b32.xlu0 %v24_v4, %s41_s0  ;;  %22 = vst.msk [vmem:[#allocation0] sm:$0xf] %vm21_vm0, %v20_v5  }
  0x7d   :  { %v26_v6 = vpop.permute.xlu0 %25  }
  0x7e   :  { %28 = vst.msk [vmem:[#allocation0] sm:$0xf] %vm27_vm1, %v26_v6  }
  0x85   :  { %v32_v7 = vld [vmem:[#allocation0] sm:$0xf] }
  0x86   :  { %34 = vst [vmem:[%s68_s1] sm:$0xf] %v32_v7 }

// kernel: tile.18
= control target key start
LH: loop header
LB: loop body
LE: loop exit
PB: predicated region body
PF: predicated region fallthrough
CT: control target
= control target key end

     0   :  { %s22_s0 = inlined_call_operand.vmem [shape: f32[2], index: 0, kind: input, shape index: {}]   ;;  %s23_s1 = inlined_call_operand.vmem [shape: f32[4,2], index: 1, kind: output, shape index: {}]  }
   0x1   :  { %v4_v0 = vld [vmem:[%s22_s0] ss:$0 sm:$0xff] }
   0x2   :  { %5 = vst [vmem:[%s23_s1] sm:$0xf] %v4_v0 }

// kernel: tile.0
= control target key start
LH: loop header
LB: loop body
LE: loop exit
PB: predicated region body
PF: predicated region fallthrough
CT: control target
= control target key end

     0   :  { %vm7_vm0 = vcmask 7168   ;;  %s37_s0 = inlined_call_operand.vmem [shape: f32[4,2], index: 0, kind: input, shape index: {}]   ;;  %s38_s1 = inlined_call_operand.vmem [shape: f32[8,1], index: 1, kind: output, shape index: {}]  }
   0x1   :  { %v4_v0 = vld [vmem:[%s37_s0] sm:$0xf]  ;;  %s17_s0 = smov 127  }
   0x2   :  { %5 = vst [vmem:[#allocation0] sm:$0xf] %v4_v0 }
   0x9   :  { %v9_v1 = vld [vmem:[#allocation0] sm:$0xf]  }
   0xa   :  { %v6_v2 = vld [vmem:[#allocation0] sm:$0xf]   ;;  %10 = vrot.lane.b32.xlu0 %v9_v1, %s17_s0 }
   0xb   :  { %8 = vst.msk [vmem:[%s38_s1] ss:$2 sm:$0xf] %vm7_vm0, %v6_v2  }
  0x7c   :  { %v11_v3 = vpop.permute.xlu0 %10  }
  0x7d   :  { %15 = vst.msk [vmem:[%s38_s1 + $0x1] ss:$2 sm:$0xf] %vm7_vm0, %v11_v3  }

// kernel: tile.23
= control target key start
LH: loop header
LB: loop body
LE: loop exit
PB: predicated region body
PF: predicated region fallthrough
CT: control target
= control target key end

     0   :  { %s22_s0 = inlined_call_operand.vmem [shape: f32[8], index: 0, kind: input, shape index: {}]   ;;  %s23_s1 = inlined_call_operand.vmem [shape: f32[4,8], index: 1, kind: output, shape index: {}]  }
   0x1   :  { %v4_v0 = vld [vmem:[%s22_s0] ss:$0 sm:$0xff] }
   0x2   :  { %5 = vst [vmem:[%s23_s1] sm:$0xf] %v4_v0 }

// kernel: tile.1
= control target key start
LH: loop header
LB: loop body
LE: loop exit
PB: predicated region body
PF: predicated region fallthrough
CT: control target
= control target key end

     0   :  { %s66_s8 = smov 125   ;;  %vm7_vm0 = vcmask 7168   ;;  %s67_s11 = smov 126   ;;  %s117_s0 = inlined_call_operand.vmem [shape: f32[4,8], index: 0, kind: input, shape index: {}]   ;;  %s118_s1 = inlined_call_operand.vmem [shape: f32[32,1], index: 1, kind: output, shape index: {}]  }
   0x1   :  { %v4_v0 = vld [vmem:[%s117_s0] sm:$0xf]  ;;  %s65_s0 = smov 127   ;;  %s68_s12 = smov 124  }
   0x2   :  { %5 = vst [vmem:[#allocation0] sm:$0xf] %v4_v0  ;;  %s69_s13 = smov 123   ;;  %s70_s14 = smov 122  }
   0x3   :  { %s71_s15 = smov 121  }
   0x9   :  { %v9_v1 = vld [vmem:[#allocation0] sm:$0xf]  }
   0xa   :  { %v21_v2 = vld [vmem:[#allocation0] sm:$0xf]   ;;  %10 = vrot.lane.b32.xlu0 %v9_v1, %s65_s0 }
   0xb   :  { %22 = vrot.lane.b32.xlu1 %v21_v2, %s66_s8  ;;  %v15_v3 = vld [vmem:[#allocation0] sm:$0xf]  }
   0xc   :  { %v27_v4 = vld [vmem:[#allocation0] sm:$0xf]  }
   0xd   :  { %v6_v5 = vld [vmem:[#allocation0] sm:$0xf]  }
   0xe   :  { %8 = vst.msk [vmem:[%s118_s1] ss:$8 sm:$0xf] %vm7_vm0, %v6_v5   ;;  %16 = vrot.lane.b32.xlu0 %v15_v3, %s67_s11  ;;  %v33_v6 = vld [vmem:[#allocation0] sm:$0xf]  }
   0xf   :  { %28 = vrot.lane.b32.xlu1 %v27_v4, %s68_s12  ;;  %v39_v7 = vld [vmem:[#allocation0] sm:$0xf]  }
  0x10   :  { %v45_v8 = vld [vmem:[#allocation0] sm:$0xf]  }
  0x12   :  { %34 = vrot.lane.b32.xlu0 %v33_v6, %s69_s13 }
  0x13   :  { %40 = vrot.lane.b32.xlu1 %v39_v7, %s70_s14 }
  0x16   :  { %46 = vrot.lane.b32.xlu0 %v45_v8, %s71_s15 }
  0x7c   :  { %v11_v9 = vpop.permute.xlu0 %10  }
  0x7d   :  { %v23_v10 = vpop.permute.xlu1 %22   ;;  %51 = vst.msk [vmem:[%s118_s1 + $0x1] ss:$8 sm:$0xf] %vm7_vm0, %v11_v9  }
  0x7e   :  { %53 = vst.msk [vmem:[%s118_s1 + $0x3] ss:$8 sm:$0xf] %vm7_vm0, %v23_v10  }
  0x80   :  { %v17_v11 = vpop.permute.xlu0 %16  }
  0x81   :  { %v29_v12 = vpop.permute.xlu1 %28   ;;  %52 = vst.msk [vmem:[%s118_s1 + $0x2] ss:$8 sm:$0xf] %vm7_vm0, %v17_v11  }
  0x82   :  { %54 = vst.msk [vmem:[%s118_s1 + $0x4] ss:$8 sm:$0xf] %vm7_vm0, %v29_v12  }
  0x84   :  { %v35_v13 = vpop.permute.xlu0 %34  }
  0x85   :  { %v41_v14 = vpop.permute.xlu1 %40   ;;  %55 = vst.msk [vmem:[%s118_s1 + $0x5] ss:$8 sm:$0xf] %vm7_vm0, %v35_v13  }
  0x86   :  { %56 = vst.msk [vmem:[%s118_s1 + $0x6] ss:$8 sm:$0xf] %vm7_vm0, %v41_v14  }
  0x88   :  { %v47_v15 = vpop.permute.xlu0 %46  }
  0x89   :  { %57 = vst.msk [vmem:[%s118_s1 + $0x7] ss:$8 sm:$0xf] %vm7_vm0, %v47_v15  }

</bundles_post_ra>
